<compile_context>
chip_gen: v7x
topology: tpu7x:2x2x1
jax: 0.10.0
libtpu: 0.0.40
codegen_flags: <defaults>
</compile_context>

<pallas_src>
import jax
import jax.numpy as jnp
from jax.experimental import pallas as pl
from jax.experimental.pallas import tpu as pltpu

EPS = 1e-8

# Deterministic synthetic physics / normalization parameters
PARAMS = dict(
    Pr=0.71, Ra=1.0e4, Ha=10.0, Da=1.0e-2, Rd=0.5, Q=1.0,
    norm_params=dict(
        u=(0.10, 0.50),   # (mean, std)
        v=(-0.05, 0.40),
        p=(0.00, 2.00),
        t=(0.50, 0.25),
    ),
)
DX = 1.0 / 16.0
DT = 1.0e-3


# ---------------------------------------------------------------------------
# Pallas kernel
# ---------------------------------------------------------------------------
def _make_kernel(b_tile, H, W, dx, dt, params):
    Pr = float(params['Pr']); Ra = float(params['Ra']); Ha = float(params['Ha'])
    Da = float(params['Da']); Rd = float(params['Rd']); Q = float(params['Q'])
    u_m, u_s = params['norm_params']['u']
    v_m, v_s = params['norm_params']['v']
    p_m, p_s = params['norm_params']['p']
    t_m, t_s = params['norm_params']['t']

    # ---- constant folding (all Python floats, done at trace time) ----
    inv_us = 1.0 / (u_s + EPS); inv_vs = 1.0 / (v_s + EPS)
    inv_ts = 1.0 / (t_s + EPS); inv_ps = 1.0 / (p_s + EPS)
    ratio_u = u_s * inv_us; ratio_v = v_s * inv_vs
    ratio_t = t_s * inv_ts; ratio_p = p_s * inv_ps          # std/(std+eps) ~ 1
    kx = 0.5 / dx                 # central-difference scale
    kl = 1.0 / (dx * dx)          # Laplacian scale
    inv_dt = 1.0 / dt

    # Normalized value of a denormalized zero — the correct pad value so that
    # zero-padding of the denormalized field is reproduced on the normalized
    # field (all stencils have zero weight-sum).
    pad_u = -u_m / u_s
    pad_v = -v_m / v_s
    pad_t = -t_m / t_s
    pad_p = -p_m / p_s
    PAD = (pad_u, pad_v, pad_t, pad_p)

    # spatial first-derivative coefficients (applied to raw neighbour
    # differences of the padded NORMALIZED fields)
    aU = ratio_u * kx; aV = ratio_v * kx; aT = ratio_t * kx; aP = ratio_p * kx
    # Laplacians are each used exactly once -> fold their PDE coefficient too
    eT = 1.0 + 4.0 * Rd / 3.0
    cLU = -Pr * ratio_u * kl
    cLV = -Pr * ratio_v * kl
    cLT = -eT * ratio_t * kl
    # normalized time derivatives: (F1n - F0n) * std/dt/(std+eps)
    cUt = ratio_u * inv_dt; cVt = ratio_v * inv_dt; cTt = ratio_t * inv_dt
    # linear field terms on the raw normalized next-state fields
    c2u = -(Pr / Da) * ratio_u                       # r2: -(Pr/Da) U1
    c3v = (Ha * Ha * Pr - Pr / Da) * ratio_v         # r3: +Ha^2 Pr V1 - (Pr/Da) V1
    c3t = -Ra * Pr * ratio_t                         # r3: -Ra Pr T1
    c4t = -Q * ratio_t                               # r4: -Q T1

    f32 = jnp.float32
    Bt = b_tile

    def kernel(now_ref, nxt_ref, out_ref):
        now = now_ref[...]   # (Bt, 3, H, W)  normalized current state (U,V,T only)
        nxt = nxt_ref[...]   # (Bt, 4, H, W)  normalized next state

        # ---- per-channel constant pad column / row (= normalized zero) ----
        padc = jnp.concatenate(
            [jnp.full((Bt, 1, H, 1), p, f32) for p in PAD], axis=1)   # (Bt,4,H,1)
        padr = jnp.concatenate(
            [jnp.full((Bt, 1, 1, W), p, f32) for p in PAD], axis=1)   # (Bt,4,1,W)

        # ---- neighbour shifts for all 4 channels at once ----
        xr = jnp.concatenate([nxt[:, :, :, 1:], padc], axis=3)       # (i, j+1)
        xl = jnp.concatenate([padc, nxt[:, :, :, :W - 1]], axis=3)   # (i, j-1)
        yd = jnp.concatenate([nxt[:, :, 1:, :], padr], axis=2)       # (i+1, j)
        yu = jnp.concatenate([padr, nxt[:, :, :H - 1, :]], axis=2)   # (i-1, j)

        ddx = xr - xl                                   # raw, unscaled
        ddy = yd - yu
        # Laplacian only for U, V, T (lap of P is never used)
        lap3 = (xr[:, :3] + xl[:, :3] + yd[:, :3] + yu[:, :3]
                - 4.0 * nxt[:, :3])

        U1n = nxt[:, 0]; V1n = nxt[:, 1]; T1n = nxt[:, 2]   # (Bt, H, W)

        # normalized spatial derivatives (norm constants folded in)
        dUdx = aU * ddx[:, 0]; dUdy = aU * ddy[:, 0]
        dVdx = aV * ddx[:, 1]; dVdy = aV * ddy[:, 1]
        dTdx = aT * ddx[:, 2]; dTdy = aT * ddy[:, 2]
        dPdx = aP * ddx[:, 3]; dPdy = aP * ddy[:, 3]
        lapU_t = cLU * lap3[:, 0]      # == -Pr          * lapU_norm
        lapV_t = cLV * lap3[:, 1]      # == -Pr          * lapV_norm
        lapT_t = cLT * lap3[:, 2]      # == -(1 + 4Rd/3) * lapT_norm

        # normalized time derivatives
        dUdt = (U1n - now[:, 0]) * cUt
        dVdt = (V1n - now[:, 1]) * cVt
        dTdt = (T1n - now[:, 2]) * cTt

        # renormalized next-state advecting velocities
        U1 = ratio_u * U1n
        V1 = ratio_v * V1n

        # PDE residuals (continuity / x-mom / y-mom / energy; scales == 1)
        r1 = dUdx + dVdy
        r2 = dUdt + U1 * dUdx + V1 * dUdy + dPdx + lapU_t + c2u * U1n
        r3 = dVdt + U1 * dVdx + V1 * dVdy + dPdy + lapV_t + c3t * T1n + c3v * V1n
        r4 = dTdt + U1 * dTdx + V1 * dTdy + lapT_t + c4t * T1n

        # elementwise accumulation of squares, then one lane + one sublane
        # reduction per batch element -> per-batch partial sums
        sq = r1 * r1 + r2 * r2 + r3 * r3 + r4 * r4      # (Bt, H, W)
        part = jnp.sum(sq, axis=2, keepdims=True)       # (Bt, H, 1)
        out_ref[...] = jnp.sum(part, axis=1, keepdims=True)   # (Bt, 1, 1)

    return kernel


def _pick_b_tile(B, H, W, vmem_budget_bytes=8 << 20):
    """Pick how many batch elements to fuse into one grid step."""
    # Rough per-batch-element VMEM footprint: (3+4) input planes, double
    # buffered, plus ~20 live full-plane f32 temporaries.
    per_b = (7 * 2 + 20) * H * W * 4
    bt = max(1, min(B, vmem_budget_bytes // max(per_b, 1)))
    while B % bt:          # keep blocks fully in-bounds (no padded garbage)
        bt -= 1
    return bt, per_b


def physics_loss_pallas(f_now, f_next, dx=DX, dt=DT, params=PARAMS):
    B, C, H, W = f_now.shape
    assert C == 4

    b_tile, per_b = _pick_b_tile(B, H, W)
    num_tiles = B // b_tile
    kernel = _make_kernel(b_tile, H, W, dx, dt, params)

    vmem_limit = int(min(64 << 20, max(16 << 20, 2 * per_b * b_tile)))

    # One grid step per batch tile, whole-image blocks, per-batch partial
    # sums -> no shared accumulator, so the batch-tile axis is "parallel".
    partials = pl.pallas_call(
        kernel,
        out_shape=jax.ShapeDtypeStruct((B, 1, 1), jnp.float32),
        grid=(num_tiles,),
        in_specs=[
            # only channels U, V, T of f_now are ever read -> 3-channel block
            pl.BlockSpec((b_tile, 3, H, W), lambda b: (b, 0, 0, 0)),
            pl.BlockSpec((b_tile, 4, H, W), lambda b: (b, 0, 0, 0)),
        ],
        out_specs=pl.BlockSpec((b_tile, 1, 1), lambda b: (b, 0, 0)),
        compiler_params=pltpu.CompilerParams(
            dimension_semantics=("parallel",),
            vmem_limit_bytes=vmem_limit),
    )(f_now.astype(jnp.float32), f_next.astype(jnp.float32))

    n_total = B * 4 * H * W
    return jnp.sum(partials) * (1.0 / n_total)


# ---------------------------------------------------------------------------
# Pure-JAX reference (mirrors the PyTorch forward: denorm -> conv2d(pad=1)
# finite differences -> renorm -> residuals -> mean of squares)
# ---------------------------------------------------------------------------
def physics_loss_ref(f_now, f_next, dx=DX, dt=DT, params=PARAMS):
    Pr = params['Pr']; Ra = params['Ra']; Ha = params['Ha']
    Da = params['Da']; Rd = params['Rd']; Q = params['Q']
    u_m, u_s = params['norm_params']['u']
    v_m, v_s = params['norm_params']['v']
    p_m, p_s = params['norm_params']['p']
    t_m, t_s = params['norm_params']['t']

    def fd(x, mode):  # x: (B,1,H,W); zero-padded stencils == F.conv2d(padding=1)
        xp = jnp.pad(x, ((0, 0), (0, 0), (1, 1), (1, 1)))
        c = xp[:, :, 1:-1, 1:-1]
        xr = xp[:, :, 1:-1, 2:]; xl = xp[:, :, 1:-1, :-2]
        yd = xp[:, :, 2:, 1:-1]; yu = xp[:, :, :-2, 1:-1]
        if mode == 'dx':
            return (xr - xl) / (2.0 * dx)
        if mode == 'dy':
            return (yd - yu) / (2.0 * dx)
        return (xr + xl + yd + yu - 4.0 * c) / (dx * dx)

    U0n, V0n, T0n, P0n = jnp.split(f_now, 4, axis=1)
    U1n, V1n, T1n, P1n = jnp.split(f_next, 4, axis=1)

    U0 = U0n * u_s + u_m; V0 = V0n * v_s + v_m; T0 = T0n * t_s + t_m
    U1 = U1n * u_s + u_m; V1 = V1n * v_s + v_m
    T1 = T1n * t_s + t_m; P1 = P1n * p_s + p_m

    dUdt = (U1 - U0) / dt; dVdt = (V1 - V0) / dt; dTdt = (T1 - T0) / dt

    dUdx = fd(U1, 'dx'); dUdy = fd(U1, 'dy')
    dVdx = fd(V1, 'dx'); dVdy = fd(V1, 'dy')
    dTdx = fd(T1, 'dx'); dTdy = fd(T1, 'dy')
    dPdx = fd(P1, 'dx'); dPdy = fd(P1, 'dy')
    lapU = fd(U1, 'lap'); lapV = fd(V1, 'lap'); lapT = fd(T1, 'lap')

    dUdt = dUdt / (u_s + EPS); dVdt = dVdt / (v_s + EPS); dTdt = dTdt / (t_s + EPS)
    U1 = (U1 - u_m) / (u_s + EPS); V1 = (V1 - v_m) / (v_s + EPS)
    T1 = (T1 - t_m) / (t_s + EPS)
    dUdx = dUdx / (u_s + EPS); dUdy = dUdy / (u_s + EPS)
    dVdx = dVdx / (v_s + EPS); dVdy = dVdy / (v_s + EPS)
    dTdx = dTdx / (t_s + EPS); dTdy = dTdy / (t_s + EPS)
    dPdx = dPdx / (p_s + EPS); dPdy = dPdy / (p_s + EPS)
    lapU = lapU / (u_s + EPS); lapV = lapV / (v_s + EPS); lapT = lapT / (t_s + EPS)

    r1 = dUdx + dVdy
    r2 = dUdt + U1 * dUdx + V1 * dUdy + dPdx - Pr * lapU - Pr / Da * U1
    r3 = (dVdt + U1 * dVdx + V1 * dVdy + dPdy - Pr * lapV - Ra * Pr * T1
          + Ha ** 2 * Pr * V1 - Pr / Da * V1)
    r4 = dTdt + U1 * dTdx + V1 * dTdy - (1.0 + 4.0 * Rd / 3.0) * lapT - Q * T1
    res = jnp.concatenate([r1, r2, r3, r4], axis=1)
    return jnp.mean(res ** 2)


if __name__ == "__main__":
    key = jax.random.PRNGKey(0)
    k1, k2 = jax.random.split(key)
    B, C, H, W = 2, 4, 16, 16
    f_now = jax.random.normal(k1, (B, C, H, W), jnp.float32)
    f_next = f_now + 0.05 * jax.random.normal(k2, (B, C, H, W), jnp.float32)

    loss_pallas = physics_loss_pallas(f_now, f_next)
    jax.block_until_ready(loss_pallas)

    loss_ref = physics_loss_ref(f_now, f_next)
    jax.block_until_ready(loss_ref)

    assert jnp.allclose(loss_pallas, loss_ref, rtol=1e-3, atol=1e-4), (
        f"mismatch: pallas={float(loss_pallas)} ref={float(loss_ref)}")
    print("KERNEL_OK")
</pallas_src>

<mosaic_0001>
module attributes {stable_mosaic.version = 11 : i64} {
  func.func @kernel(%arg0: i32, %arg1: memref<2x3x16x16xf32, #tpu.memory_space<vmem>>, %arg2: memref<2x4x16x16xf32, #tpu.memory_space<vmem>>, %arg3: memref<2x1x1xf32, #tpu.memory_space<vmem>>) attributes {dimension_semantics = [#tpu.dimension_semantics<parallel>], iteration_bounds = array<i64: 1>, scalar_prefetch = 0 : i64, scratch_operands = 0 : i64, tpu.core_type = #tpu.core_type<tc>, window_params = [{transform_indices = @transform_0, window_bounds = array<i64: 2, 3, 16, 16>}, {transform_indices = @transform_1, window_bounds = array<i64: 2, 4, 16, 16>}, {transform_indices = @transform_2, window_bounds = array<i64: 2, 1, 1>}]} {
    %c0 = arith.constant 0 : index
    %c0_0 = arith.constant 0 : index
    %c0_1 = arith.constant 0 : index
    %c0_2 = arith.constant 0 : index
    %0 = vector.load %arg1[%c0, %c0_0, %c0_1, %c0_2] : memref<2x3x16x16xf32, #tpu.memory_space<vmem>>, vector<2x3x16x16xf32>
    %c0_3 = arith.constant 0 : index
    %c0_4 = arith.constant 0 : index
    %c0_5 = arith.constant 0 : index
    %c0_6 = arith.constant 0 : index
    %1 = vector.load %arg2[%c0_3, %c0_4, %c0_5, %c0_6] : memref<2x4x16x16xf32, #tpu.memory_space<vmem>>, vector<2x4x16x16xf32>
    %cst = arith.constant -2.000000e-01 : f32
    %2 = vector.broadcast %cst : f32 to vector<2x1x16x1xf32>
    %cst_7 = arith.constant 1.250000e-01 : f32
    %3 = vector.broadcast %cst_7 : f32 to vector<2x1x16x1xf32>
    %cst_8 = arith.constant -2.000000e+00 : f32
    %4 = vector.broadcast %cst_8 : f32 to vector<2x1x16x1xf32>
    %cst_9 = arith.constant -0.000000e+00 : f32
    %5 = vector.broadcast %cst_9 : f32 to vector<2x1x16x1xf32>
    %6 = tpu.concatenate %2, %3, %4, %5 in 1 : vector<2x1x16x1xf32>, vector<2x1x16x1xf32>, vector<2x1x16x1xf32>, vector<2x1x16x1xf32> -> vector<2x4x16x1xf32>
    %cst_10 = arith.constant -2.000000e-01 : f32
    %7 = vector.broadcast %cst_10 : f32 to vector<2x1x1x16xf32>
    %cst_11 = arith.constant 1.250000e-01 : f32
    %8 = vector.broadcast %cst_11 : f32 to vector<2x1x1x16xf32>
    %cst_12 = arith.constant -2.000000e+00 : f32
    %9 = vector.broadcast %cst_12 : f32 to vector<2x1x1x16xf32>
    %cst_13 = arith.constant -0.000000e+00 : f32
    %10 = vector.broadcast %cst_13 : f32 to vector<2x1x1x16xf32>
    %11 = tpu.concatenate %7, %8, %9, %10 in 1 : vector<2x1x1x16xf32>, vector<2x1x1x16xf32>, vector<2x1x1x16xf32>, vector<2x1x1x16xf32> -> vector<2x4x1x16xf32>
    %12 = vector.extract_strided_slice %1 {offsets = [0, 0, 0, 1], sizes = [2, 4, 16, 15], strides = [1, 1, 1, 1]} : vector<2x4x16x16xf32> to vector<2x4x16x15xf32>
    %13 = tpu.concatenate %12, %6 in 3 : vector<2x4x16x15xf32>, vector<2x4x16x1xf32> -> vector<2x4x16x16xf32>
    %14 = vector.extract_strided_slice %1 {offsets = [0, 0, 0, 0], sizes = [2, 4, 16, 15], strides = [1, 1, 1, 1]} : vector<2x4x16x16xf32> to vector<2x4x16x15xf32>
    %15 = tpu.concatenate %6, %14 in 3 : vector<2x4x16x1xf32>, vector<2x4x16x15xf32> -> vector<2x4x16x16xf32>
    %16 = vector.extract_strided_slice %1 {offsets = [0, 0, 1, 0], sizes = [2, 4, 15, 16], strides = [1, 1, 1, 1]} : vector<2x4x16x16xf32> to vector<2x4x15x16xf32>
    %17 = tpu.concatenate %16, %11 in 2 : vector<2x4x15x16xf32>, vector<2x4x1x16xf32> -> vector<2x4x16x16xf32>
    %18 = vector.extract_strided_slice %1 {offsets = [0, 0, 0, 0], sizes = [2, 4, 15, 16], strides = [1, 1, 1, 1]} : vector<2x4x16x16xf32> to vector<2x4x15x16xf32>
    %19 = tpu.concatenate %11, %18 in 2 : vector<2x4x1x16xf32>, vector<2x4x15x16xf32> -> vector<2x4x16x16xf32>
    %20 = arith.subf %13, %15 : vector<2x4x16x16xf32>
    %21 = arith.subf %17, %19 : vector<2x4x16x16xf32>
    %22 = vector.extract_strided_slice %13 {offsets = [0, 0, 0, 0], sizes = [2, 3, 16, 16], strides = [1, 1, 1, 1]} : vector<2x4x16x16xf32> to vector<2x3x16x16xf32>
    %23 = vector.extract_strided_slice %15 {offsets = [0, 0, 0, 0], sizes = [2, 3, 16, 16], strides = [1, 1, 1, 1]} : vector<2x4x16x16xf32> to vector<2x3x16x16xf32>
    %24 = arith.addf %22, %23 : vector<2x3x16x16xf32>
    %25 = vector.extract_strided_slice %17 {offsets = [0, 0, 0, 0], sizes = [2, 3, 16, 16], strides = [1, 1, 1, 1]} : vector<2x4x16x16xf32> to vector<2x3x16x16xf32>
    %26 = arith.addf %24, %25 : vector<2x3x16x16xf32>
    %27 = vector.extract_strided_slice %19 {offsets = [0, 0, 0, 0], sizes = [2, 3, 16, 16], strides = [1, 1, 1, 1]} : vector<2x4x16x16xf32> to vector<2x3x16x16xf32>
    %28 = arith.addf %26, %27 : vector<2x3x16x16xf32>
    %29 = vector.extract_strided_slice %1 {offsets = [0, 0, 0, 0], sizes = [2, 3, 16, 16], strides = [1, 1, 1, 1]} : vector<2x4x16x16xf32> to vector<2x3x16x16xf32>
    %cst_14 = arith.constant 4.000000e+00 : f32
    %30 = vector.broadcast %cst_14 : f32 to vector<2x3x16x16xf32>
    %31 = arith.mulf %30, %29 : vector<2x3x16x16xf32>
    %32 = arith.subf %28, %31 : vector<2x3x16x16xf32>
    %33 = vector.extract_strided_slice %1 {offsets = [0, 0, 0, 0], sizes = [2, 1, 16, 16], strides = [1, 1, 1, 1]} : vector<2x4x16x16xf32> to vector<2x1x16x16xf32>
    %34 = vector.shape_cast %33 : vector<2x1x16x16xf32> to vector<2x16x16xf32>
    %35 = vector.extract_strided_slice %1 {offsets = [0, 1, 0, 0], sizes = [2, 1, 16, 16], strides = [1, 1, 1, 1]} : vector<2x4x16x16xf32> to vector<2x1x16x16xf32>
    %36 = vector.shape_cast %35 : vector<2x1x16x16xf32> to vector<2x16x16xf32>
    %37 = vector.extract_strided_slice %1 {offsets = [0, 2, 0, 0], sizes = [2, 1, 16, 16], strides = [1, 1, 1, 1]} : vector<2x4x16x16xf32> to vector<2x1x16x16xf32>
    %38 = vector.shape_cast %37 : vector<2x1x16x16xf32> to vector<2x16x16xf32>
    %39 = vector.extract_strided_slice %20 {offsets = [0, 0, 0, 0], sizes = [2, 1, 16, 16], strides = [1, 1, 1, 1]} : vector<2x4x16x16xf32> to vector<2x1x16x16xf32>
    %40 = vector.shape_cast %39 : vector<2x1x16x16xf32> to vector<2x16x16xf32>
    %cst_15 = arith.constant 8.000000e+00 : f32
    %41 = vector.broadcast %cst_15 : f32 to vector<2x16x16xf32>
    %42 = arith.mulf %41, %40 : vector<2x16x16xf32>
    %43 = vector.extract_strided_slice %21 {offsets = [0, 0, 0, 0], sizes = [2, 1, 16, 16], strides = [1, 1, 1, 1]} : vector<2x4x16x16xf32> to vector<2x1x16x16xf32>
    %44 = vector.shape_cast %43 : vector<2x1x16x16xf32> to vector<2x16x16xf32>
    %cst_16 = arith.constant 8.000000e+00 : f32
    %45 = vector.broadcast %cst_16 : f32 to vector<2x16x16xf32>
    %46 = arith.mulf %45, %44 : vector<2x16x16xf32>
    %47 = vector.extract_strided_slice %20 {offsets = [0, 1, 0, 0], sizes = [2, 1, 16, 16], strides = [1, 1, 1, 1]} : vector<2x4x16x16xf32> to vector<2x1x16x16xf32>
    %48 = vector.shape_cast %47 : vector<2x1x16x16xf32> to vector<2x16x16xf32>
    %cst_17 = arith.constant 8.000000e+00 : f32
    %49 = vector.broadcast %cst_17 : f32 to vector<2x16x16xf32>
    %50 = arith.mulf %49, %48 : vector<2x16x16xf32>
    %51 = vector.extract_strided_slice %21 {offsets = [0, 1, 0, 0], sizes = [2, 1, 16, 16], strides = [1, 1, 1, 1]} : vector<2x4x16x16xf32> to vector<2x1x16x16xf32>
    %52 = vector.shape_cast %51 : vector<2x1x16x16xf32> to vector<2x16x16xf32>
    %cst_18 = arith.constant 8.000000e+00 : f32
    %53 = vector.broadcast %cst_18 : f32 to vector<2x16x16xf32>
    %54 = arith.mulf %53, %52 : vector<2x16x16xf32>
    %55 = vector.extract_strided_slice %20 {offsets = [0, 2, 0, 0], sizes = [2, 1, 16, 16], strides = [1, 1, 1, 1]} : vector<2x4x16x16xf32> to vector<2x1x16x16xf32>
    %56 = vector.shape_cast %55 : vector<2x1x16x16xf32> to vector<2x16x16xf32>
    %cst_19 = arith.constant 7.99999952 : f32
    %57 = vector.broadcast %cst_19 : f32 to vector<2x16x16xf32>
    %58 = arith.mulf %57, %56 : vector<2x16x16xf32>
    %59 = vector.extract_strided_slice %21 {offsets = [0, 2, 0, 0], sizes = [2, 1, 16, 16], strides = [1, 1, 1, 1]} : vector<2x4x16x16xf32> to vector<2x1x16x16xf32>
    %60 = vector.shape_cast %59 : vector<2x1x16x16xf32> to vector<2x16x16xf32>
    %cst_20 = arith.constant 7.99999952 : f32
    %61 = vector.broadcast %cst_20 : f32 to vector<2x16x16xf32>
    %62 = arith.mulf %61, %60 : vector<2x16x16xf32>
    %63 = vector.extract_strided_slice %20 {offsets = [0, 3, 0, 0], sizes = [2, 1, 16, 16], strides = [1, 1, 1, 1]} : vector<2x4x16x16xf32> to vector<2x1x16x16xf32>
    %64 = vector.shape_cast %63 : vector<2x1x16x16xf32> to vector<2x16x16xf32>
    %cst_21 = arith.constant 8.000000e+00 : f32
    %65 = vector.broadcast %cst_21 : f32 to vector<2x16x16xf32>
    %66 = arith.mulf %65, %64 : vector<2x16x16xf32>
    %67 = vector.extract_strided_slice %21 {offsets = [0, 3, 0, 0], sizes = [2, 1, 16, 16], strides = [1, 1, 1, 1]} : vector<2x4x16x16xf32> to vector<2x1x16x16xf32>
    %68 = vector.shape_cast %67 : vector<2x1x16x16xf32> to vector<2x16x16xf32>
    %cst_22 = arith.constant 8.000000e+00 : f32
    %69 = vector.broadcast %cst_22 : f32 to vector<2x16x16xf32>
    %70 = arith.mulf %69, %68 : vector<2x16x16xf32>
    %71 = vector.extract_strided_slice %32 {offsets = [0, 0, 0, 0], sizes = [2, 1, 16, 16], strides = [1, 1, 1, 1]} : vector<2x3x16x16xf32> to vector<2x1x16x16xf32>
    %72 = vector.shape_cast %71 : vector<2x1x16x16xf32> to vector<2x16x16xf32>
    %cst_23 = arith.constant -1.817600e+02 : f32
    %73 = vector.broadcast %cst_23 : f32 to vector<2x16x16xf32>
    %74 = arith.mulf %73, %72 : vector<2x16x16xf32>
    %75 = vector.extract_strided_slice %32 {offsets = [0, 1, 0, 0], sizes = [2, 1, 16, 16], strides = [1, 1, 1, 1]} : vector<2x3x16x16xf32> to vector<2x1x16x16xf32>
    %76 = vector.shape_cast %75 : vector<2x1x16x16xf32> to vector<2x16x16xf32>
    %cst_24 = arith.constant -1.817600e+02 : f32
    %77 = vector.broadcast %cst_24 : f32 to vector<2x16x16xf32>
    %78 = arith.mulf %77, %76 : vector<2x16x16xf32>
    %79 = vector.extract_strided_slice %32 {offsets = [0, 2, 0, 0], sizes = [2, 1, 16, 16], strides = [1, 1, 1, 1]} : vector<2x3x16x16xf32> to vector<2x1x16x16xf32>
    %80 = vector.shape_cast %79 : vector<2x1x16x16xf32> to vector<2x16x16xf32>
    %cst_25 = arith.constant -426.666656 : f32
    %81 = vector.broadcast %cst_25 : f32 to vector<2x16x16xf32>
    %82 = arith.mulf %81, %80 : vector<2x16x16xf32>
    %83 = vector.extract_strided_slice %0 {offsets = [0, 0, 0, 0], sizes = [2, 1, 16, 16], strides = [1, 1, 1, 1]} : vector<2x3x16x16xf32> to vector<2x1x16x16xf32>
    %84 = vector.shape_cast %83 : vector<2x1x16x16xf32> to vector<2x16x16xf32>
    %85 = arith.subf %34, %84 : vector<2x16x16xf32>
    %cst_26 = arith.constant 1.000000e+03 : f32
    %86 = vector.broadcast %cst_26 : f32 to vector<2x16x16xf32>
    %87 = arith.mulf %85, %86 : vector<2x16x16xf32>
    %88 = vector.extract_strided_slice %0 {offsets = [0, 1, 0, 0], sizes = [2, 1, 16, 16], strides = [1, 1, 1, 1]} : vector<2x3x16x16xf32> to vector<2x1x16x16xf32>
    %89 = vector.shape_cast %88 : vector<2x1x16x16xf32> to vector<2x16x16xf32>
    %90 = arith.subf %36, %89 : vector<2x16x16xf32>
    %cst_27 = arith.constant 1.000000e+03 : f32
    %91 = vector.broadcast %cst_27 : f32 to vector<2x16x16xf32>
    %92 = arith.mulf %90, %91 : vector<2x16x16xf32>
    %93 = vector.extract_strided_slice %0 {offsets = [0, 2, 0, 0], sizes = [2, 1, 16, 16], strides = [1, 1, 1, 1]} : vector<2x3x16x16xf32> to vector<2x1x16x16xf32>
    %94 = vector.shape_cast %93 : vector<2x1x16x16xf32> to vector<2x16x16xf32>
    %95 = arith.subf %38, %94 : vector<2x16x16xf32>
    %cst_28 = arith.constant 999.999938 : f32
    %96 = vector.broadcast %cst_28 : f32 to vector<2x16x16xf32>
    %97 = arith.mulf %95, %96 : vector<2x16x16xf32>
    %cst_29 = arith.constant 1.000000e+00 : f32
    %98 = vector.broadcast %cst_29 : f32 to vector<2x16x16xf32>
    %99 = arith.mulf %98, %34 : vector<2x16x16xf32>
    %cst_30 = arith.constant 1.000000e+00 : f32
    %100 = vector.broadcast %cst_30 : f32 to vector<2x16x16xf32>
    %101 = arith.mulf %100, %36 : vector<2x16x16xf32>
    %102 = arith.addf %42, %54 : vector<2x16x16xf32>
    %103 = arith.mulf %99, %42 : vector<2x16x16xf32>
    %104 = arith.addf %87, %103 : vector<2x16x16xf32>
    %105 = arith.mulf %101, %46 : vector<2x16x16xf32>
    %106 = arith.addf %104, %105 : vector<2x16x16xf32>
    %107 = arith.addf %106, %66 : vector<2x16x16xf32>
    %108 = arith.addf %107, %74 : vector<2x16x16xf32>
    %cst_31 = arith.constant -7.100000e+01 : f32
    %109 = vector.broadcast %cst_31 : f32 to vector<2x16x16xf32>
    %110 = arith.mulf %109, %34 : vector<2x16x16xf32>
    %111 = arith.addf %108, %110 : vector<2x16x16xf32>
    %112 = arith.mulf %99, %50 : vector<2x16x16xf32>
    %113 = arith.addf %92, %112 : vector<2x16x16xf32>
    %114 = arith.mulf %101, %54 : vector<2x16x16xf32>
    %115 = arith.addf %113, %114 : vector<2x16x16xf32>
    %116 = arith.addf %115, %70 : vector<2x16x16xf32>
    %117 = arith.addf %116, %78 : vector<2x16x16xf32>
    %cst_32 = arith.constant -7099.99951 : f32
    %118 = vector.broadcast %cst_32 : f32 to vector<2x16x16xf32>
    %119 = arith.mulf %118, %38 : vector<2x16x16xf32>
    %120 = arith.addf %117, %119 : vector<2x16x16xf32>
    %cst_33 = arith.constant 0.000000e+00 : f32
    %121 = vector.broadcast %cst_33 : f32 to vector<2x16x16xf32>
    %122 = arith.mulf %121, %36 : vector<2x16x16xf32>
    %123 = arith.addf %120, %122 : vector<2x16x16xf32>
    %124 = arith.mulf %99, %58 : vector<2x16x16xf32>
    %125 = arith.addf %97, %124 : vector<2x16x16xf32>
    %126 = arith.mulf %101, %62 : vector<2x16x16xf32>
    %127 = arith.addf %125, %126 : vector<2x16x16xf32>
    %128 = arith.addf %127, %82 : vector<2x16x16xf32>
    %cst_34 = arith.constant -0.99999994 : f32
    %129 = vector.broadcast %cst_34 : f32 to vector<2x16x16xf32>
    %130 = arith.mulf %129, %38 : vector<2x16x16xf32>
    %131 = arith.addf %128, %130 : vector<2x16x16xf32>
    %132 = arith.mulf %102, %102 : vector<2x16x16xf32>
    %133 = arith.mulf %111, %111 : vector<2x16x16xf32>
    %134 = arith.addf %132, %133 : vector<2x16x16xf32>
    %135 = arith.mulf %123, %123 : vector<2x16x16xf32>
    %136 = arith.addf %134, %135 : vector<2x16x16xf32>
    %137 = arith.mulf %131, %131 : vector<2x16x16xf32>
    %138 = arith.addf %136, %137 : vector<2x16x16xf32>
    %cst_35 = arith.constant dense<0.000000e+00> : vector<2x16xf32>
    %139 = vector.multi_reduction <add>, %138, %cst_35 [2] : vector<2x16x16xf32> to vector<2x16xf32>
    %140 = vector.shape_cast %139 : vector<2x16xf32> to vector<2x16x1xf32>
    %cst_36 = arith.constant dense<0.000000e+00> : vector<2x1xf32>
    %141 = vector.multi_reduction <add>, %140, %cst_36 [1] : vector<2x16x1xf32> to vector<2x1xf32>
    %142 = vector.shape_cast %141 : vector<2x1xf32> to vector<2x1x1xf32>
    %c0_37 = arith.constant 0 : index
    %c0_38 = arith.constant 0 : index
    %c0_39 = arith.constant 0 : index
    %143 = vector.load %arg3[%c0_37, %c0_38, %c0_39] : memref<2x1x1xf32, #tpu.memory_space<vmem>>, vector<2x1x1xf32>
    tpu.vector_store %arg3[%c0_37, %c0_38, %c0_39], %142 {strides = array<i32>} : memref<2x1x1xf32, #tpu.memory_space<vmem>>, vector<2x1x1xf32>,
    return
  }
  func.func @transform_0(%arg0: i32) -> (i32, i32, i32, i32) {
    %c0_i32 = arith.constant 0 : i32
    %c0_i32_0 = arith.constant 0 : i32
    %c0_i32_1 = arith.constant 0 : i32
    %c0_i32_2 = arith.constant 0 : i32
    return %arg0, %c0_i32, %c0_i32_0, %c0_i32_1 : i32, i32, i32, i32
  }
  func.func @transform_1(%arg0: i32) -> (i32, i32, i32, i32) {
    %c0_i32 = arith.constant 0 : i32
    %c0_i32_0 = arith.constant 0 : i32
    %c0_i32_1 = arith.constant 0 : i32
    %c0_i32_2 = arith.constant 0 : i32
    return %arg0, %c0_i32, %c0_i32_0, %c0_i32_1 : i32, i32, i32, i32
  }
  func.func @transform_2(%arg0: i32) -> (i32, i32, i32) {
    %c0_i32 = arith.constant 0 : i32
    %c0_i32_0 = arith.constant 0 : i32
    %c0_i32_1 = arith.constant 0 : i32
    return %arg0, %c0_i32, %c0_i32_0 : i32, i32, i32
  }
}

</mosaic_0001>

<bundles_post_ra>
// kernel: tpu_custom_call.1
= control target key start
LH: loop header
LB: loop body
LE: loop exit
PB: predicated region body
PF: predicated region fallthrough
CT: control target
= control target key end

     0   :  { %7 = vsyncpa [#allocation3], 0  ;;  %s1502_s0 = inlined_call_operand.hbm [shape: f32[2,4,16,16], index: 0, kind: input, shape index: {}]   ;;  %s1503_s1 = inlined_call_operand.hbm [shape: f32[2,4,16,16], index: 1, kind: input, shape index: {}]   ;;  %s1504_s2 = inlined_call_operand.vmem [shape: f32[2,1,1], index: 2, kind: output, shape index: {}]  }
   0x1   :  { %8 = vsyncpa [#allocation5], 0 }
   0x2   :  { %s18_s9 = sld [smem:[#allocation0]]   ;;  %s739_s10 = smov [#allocation2]  }
   0x3   :  { %s26_s11 = sshll.u32 %s739_s10, 4  ;;  %s740_s12 = smov 1024   ;;  %s27_s11 = int_to_ptr.vmem [resolvable:$true] %s26_s11 }
   0x4   :  { %33 = sst [smem:[#allocation7]] %s740_s12  ;;  %s741_s13 = smov 768  }
   0x5   :  { %35 = sst [smem:[#allocation7 + $0x1]] %s741_s13  ;;  %s742_s14 = smov 6  }
   0x6   :  { %37 = sst [smem:[#allocation7 + $0x2]] %s742_s14  ;;  %s743_s16 = smov 128  }
   0x7   :  { %39 = sst [smem:[#allocation7 + $0x3]] %s743_s16  ;;  %s744_s18 = smov 8  }
   0x8   :  { %s688_s15 = sshll.u32 %s18_s9, 26  ;;  %41 = sst [smem:[#allocation7 + $0x4]] %s743_s16 }
   0x9   :  { %s689_s17 = sadd.s32 134217728, %s688_s15  ;;  %43 = sst [smem:[#allocation7 + $0x5]] %s744_s18 }
   0xa   :  { %s745_s19 = smov [#allocation3]   ;;  %s746_s20 = smov [#allocation6]  }
   0xb   :  { %45 = dma.general %s1502_s0, 1536, %s27_s11, %s745_s19, %s746_s20, [#allocation7], %s689_s17, 0  }
   0xc   :  { %s747_s23 = smov [#allocation4]   ;;  %s713_s27 = scalar_lea.hbm %s1503_s1, 2048 }
   0xd   :  { %s51_s24 = sshll.u32 %s747_s23, 4  ;;  %p714_p0 = scmp.ne.s32.totalorder %s1503_s1, %s713_s27  ;;  %s52_s24 = int_to_ptr.vmem [resolvable:$true] %s51_s24 }
   0xe   :  { %p717_p1 = scmp.lt.u32.totalorder %s713_s27, %s1503_s1 }
  0x10   :  { %p719_p2 = pnand %p717_p1, %p714_p0 }
  0x12   :  { %722 = shalt.err (!%p719_p2)
}
  0x13   :  { %s723_s4 = scalar_lea.vmem %s52_s24, 2048  ;;  %p728_p4 = scmp.lt.s32.totalorder %s52_s24, %s52_s24 }
  0x14   :  { %p724_p3 = scmp.ne.s32.totalorder %s52_s24, %s723_s4  ;;  %p729_p5 = scmp.lt.s32.totalorder %s723_s4, %s723_s4 }
  0x16   :  { %p730_p6 = por %p729_p5, %p728_p4 }
  0x18   :  { %p731_p7 = pnand %p730_p6, %p724_p3 }
  0x1a   :  { %734 = shalt.err (!%p731_p7)
}
  0x1b   :  { %s748_s0 = smov 128   ;;  %s749_s5 = smov 8  }
  0x1c   :  { %57 = dma.hbm_to_vmem [thread:$0]  %s1503_s1, 2048, %s52_s24, [#allocation5], %s748_s0, %s748_s0, %s749_s5  }
  0x1d   :  { %735 = dma.done.wait [#allocation3], 1536  }
  0x1e   :  { %736 = vsyncadd [#allocation3], 4294965760 }
  0x1f   :  { %737 = dma.done.wait [#allocation5], 2048  }
  0x20   :  { %738 = vsyncadd [#allocation5], 4294965248  ;;  %v788_v0 = vld [vmem:[#allocation4 + $0x10] sm:$0xff]  ;;  %v790_v1 = vld [vmem:[#allocation4] sm:$0xff]  ;;  %s750_s8 = smov 127   ;;  %v751_v4 = vmov 0.125  }
  0x21   :  { %112 = vrot.lane.b32.xlu1 %v788_v0, %s750_s8  ;;  %108 = vrot.lane.b32.xlu0 %v790_v1, %s750_s8  ;;  %v796_v2 = vld [vmem:[#allocation4 + $0x18] sm:$0xff]  ;;  %v798_v3 = vld [vmem:[#allocation4 + $0x8] sm:$0xff]  ;;  %v800_v5 = vrot.slane %v751_v4, 1  ;;  %v804_v7 = vld [vmem:[#allocation4 + $0x30] sm:$0xff]  ;;  %vm254_vm0 = vcmask 1046528   ;;  %v752_v8 = vmov -0.0  }
  0x22   :  { %v802_v6 = vld [vmem:[#allocation4 + $0x38] sm:$0xff]  ;;  %v298_v9 = vrot.slane %v752_v8, 1  ;;  %v264_v12 = vrot.slane %v804_v7, 1  ;;  %v321_v13 = vrot.slane %v804_v7, 7  ;;  %vm311_vm1 = vcmask 1040384   ;;  %v820_v18 = vld [vmem:[#allocation4 + $0x48] sm:$0xff] }
  0x23   :  { %v265_v10 = vrot.slane %v802_v6, 1  ;;  %v322_v11 = vrot.slane %v802_v6, 7  ;;  %v815_v14 = vld [vmem:[#allocation4 + $0x78] sm:$0xff]  ;;  %v259_v15 = vrot.slane %v796_v2, 1  ;;  %v315_v16 = vrot.slane %v788_v0, 7  ;;  %v822_v19 = vld [vmem:[#allocation4 + $0x40] sm:$0xff] }
  0x24   :  { %v316_v17 = vrot.slane %v796_v2, 7  ;;  %v828_v21 = vsel %vm311_vm1, -0.0, %v321_v13  ;;  %v277_v22 = vrot.slane %v815_v14, 1  ;;  %v334_v23 = vrot.slane %v815_v14, 7  ;;  %v832_v24 = vld [vmem:[#allocation4 + $0x70] sm:$0xff]  ;;  %v867_v36 = vld [vmem:[#allocation4 + $0x58] sm:$0xff] }
  0x25   :  { %114 = vrot.lane.b32.xlu1 %v796_v2, %s750_s8  ;;  %110 = vrot.lane.b32.xlu0 %v798_v3, %s750_s8  ;;  %v825_v20 = vsel %vm254_vm0, %v264_v12, %v265_v10  ;;  %v276_v26 = vrot.slane %v832_v24, 1  ;;  %v333_v27 = vrot.slane %v832_v24, 7  ;;  %v839_v28 = vsel %vm254_vm0, %v265_v10, %v298_v9  ;;  %v869_v37 = vld [vmem:[#allocation4 + $0x50] sm:$0xff]  ;;  %s755_s1 = smov 15   ;;  %s756_s9 = smov 1  }
  0x26   :  { %v842_v29 = vsel %vm254_vm0, %v277_v22, %v298_v9  ;;  %v845_v30 = vsel %vm311_vm1, %v321_v13, %v322_v11  ;;  %v849_v31 = vsel %vm254_vm0, %v259_v15, %v800_v5  ;;  %v852_v32 = vsel %vm311_vm1, %v315_v16, %v316_v17 }
  0x27   :  { %v859_v33 = vsel %vm254_vm0, %v276_v26, %v277_v22  ;;  %v862_v34 = vsel %vm311_vm1, -0.0, %v333_v27  ;;  %v865_v35 = vsel %vm311_vm1, %v333_v27, %v334_v23  ;;  %v379_v41 = vsub.f32 %v849_v31, %v852_v32 }
  0x28   :  { %v753_v43 = vmov -0.2   ;;  %v256_v45 = vrot.slane %v798_v3, 1  ;;  %v1507_v46 = vrot.slane %v790_v1, 7  ;;  %v313_v48 = vrot.slane %v798_v3, 7 }
  0x29   :  { %126 = vrot.lane.b32.xlu1 %v820_v18, %s750_s8  ;;  %124 = vrot.lane.b32.xlu0 %v822_v19, %s750_s8  ;;  %v879_v42 = vmul.f32 8.0, %v379_v41  ;;  %v295_v44 = vrot.slane %v753_v43, 1  ;;  %v258_v49 = vrot.slane %v788_v0, 1  ;;  %v894_v50 = vsel %vm311_vm1, 0.125, %v315_v16 }
  0x2a   :  { %v754_v52 = vmov 0.125|-2.0   ;;  %v911_v55 = vsel %vm311_vm1, %v1507_v46, %v313_v48  ;;  %v271_v56 = vrot.slane %v867_v36, 1  ;;  %v327_v58 = vrot.slane %v869_v37, 7 }
  0x2b   :  { %v889_v47 = vmul.f32 %v879_v42, %v796_v2  ;;  %v897_v51 = vsel %vm254_vm0, %v258_v49, %v259_v15  ;;  %v906_v54 = vsel %vm254_vm0, %v256_v45, %v295_v44  ;;  %v328_v59 = vrot.slane %v867_v36, 7  ;;  %v988_v49 = vld [vmem:[#allocation4 + $0x28] sm:$0xff] }
  0x2c   :  { %v378_v53 = vsub.f32 %v897_v51, %v894_v50  ;;  %v920_v60 = vsel %vm254_vm0, %v271_v56, %v800_v5  ;;  %v377_v61 = vsub.f32 %v906_v54, %v911_v55  ;;  %v1506_v63 = vrot.slane %v820_v18, 1 }
  0x2d   :  { %130 = vrot.lane.b32.xlu1 %v867_v36, %s750_s8  ;;  %128 = vrot.lane.b32.xlu0 %v869_v37, %s750_s8  ;;  %v934_v4 = vsel %vm311_vm1, %v327_v58, %v328_v59  ;;  %v1505_v5 = vrot.slane %v822_v19, 7  ;;  %v325_v9 = vrot.slane %v820_v18, 7  ;;  %v270_v11 = vrot.slane %v869_v37, 1 }
  0x2e   :  { %v914_v57 = vmul.f32 8.0, %v378_v53  ;;  %1521 = vst [vmem:[#allocation10_spill] sm:$0xff] %v934_v4  ;;  %v387_v10 = vsub.f32 %v920_v60, %v934_v4  ;;  %v942_v12 = vsel %vm311_vm1, 0.125, %v327_v58  ;;  %v457_v16 = vmul.f32 8.0, %v377_v61  ;;  %v1006_v61 = vld [vmem:[#allocation4 + $0x68] sm:$0xff] }
  0x2f   :  { %1522 = vst [vmem:[#allocation11_spill] sm:$0xff] %v942_v12  ;;  %v945_v13 = vsel %vm254_vm0, %v270_v11, %v271_v56  ;;  %v956_v17 = vsel %vm254_vm0, %v1506_v63, %v295_v44  ;;  %v961_v22 = vsel %vm311_vm1, %v1505_v5, %v325_v9  ;;  %v262_v58 = vrot.slane %v988_v49, 1  ;;  %v1008_v9 = vld [vmem:[#allocation4 + $0x60] sm:$0xff] }
  0x30   :  { %v930_v62 = vmul.f32 %v914_v57, %v788_v0  ;;  %v386_v15 = vsub.f32 %v945_v13, %v942_v12  ;;  %v963_v23 = vmul.f32 8.0, %v387_v10  ;;  %v385_v27 = vsub.f32 %v956_v17, %v961_v22 }
  0x31   :  { %709 = vrot.lane.b32.xlu1 %v754_v52, %s755_s1  ;;  %160 = vrot.lane.b32.xlu0 %v753_v43, %s755_s1  ;;  %v982_v44 = vmul.f32 %v457_v16, %v796_v2  ;;  %v990_v52 = vld [vmem:[#allocation4 + $0x20] sm:$0xff]  ;;  %v330_v39 = vrot.slane %v1008_v9, 7  ;;  %v331_v46 = vrot.slane %v1006_v61, 7  ;;  %vm237_vm2 = vcmask 7168  }
  0x32   :  { %1523 = vst [vmem:[#allocation12_spill] sm:$0xff] %v963_v23  ;;  %v965_v26 = vmul.f32 8.0, %v386_v15  ;;  %v975_v41 = vmul.f32 %v963_v23, %v867_v36  ;;  %v459_v48 = vmul.f32 8.0, %v385_v27  ;;  %v261_v56 = vrot.slane %v990_v52, 1 }
  0x33   :  { %1527 = vst [vmem:[#allocation16_spill] sm:$0xff] %v982_v44  ;;  %v318_v59 = vrot.slane %v990_v52, 7  ;;  %v73_v44 = vld [vmem:[#allocation2 + $0x48] sm:$0xff]  ;;  %vm172_vm3 = vcmask 121856   ;;  %v1183_v12 = vmul.f32 4.0, %v822_v19  ;;  %vm652_vm4 = vcmask 130048  }
  0x34   :  { %1524 = vst [vmem:[#allocation13_spill] sm:$0xff] %v965_v26  ;;  %1525 = vst [vmem:[#allocation14_spill] sm:$0xff] %v975_v41  ;;  %v979_v43 = vmul.f32 %v965_v26, %v869_v37  ;;  %v997_v53 = vmul.f32 %v459_v48, %v867_v36  ;;  %v1011_v10 = vsel %vm254_vm0, %v261_v56, %v262_v58  ;;  %v757_v48 = vmov -2.0  }
  0x35   :  { %191 = vrot.lane.b32.xlu1 %v798_v3, %s756_s9  ;;  %189 = vrot.lane.b32.xlu0 %v790_v1, %s756_s9  ;;  %1529 = vst [vmem:[#allocation18_spill] sm:$0xff] %v1011_v10  ;;  %v1014_v11 = vsel %vm311_vm1, -2.0, %v318_v59  ;;  %v297_v40 = vrot.slane %v757_v48, 1  ;;  %v274_v48 = vrot.slane %v1006_v61, 1  ;;  %v1546_v41 = vsub.f32 %v859_v33, %v862_v34  ;;  %1555 = vst [vmem:[#allocation37_spill] sm:$0xff] %v1183_v12 }
  0x36   :  { %1526 = vst [vmem:[#allocation15_spill] sm:$0xff] %v979_v43  ;;  %1528 = vst [vmem:[#allocation17_spill] sm:$0xff] %v997_v53  ;;  %v380_v15 = vsub.f32 %v1011_v10, %v1014_v11  ;;  %v72_v43 = vld [vmem:[#allocation2 + $0x40] sm:$0xff]  ;;  %v1153_v34 = vmul.f32 4.0, %v798_v3  ;;  %v1206_v12 = vmul.f32 -7099.9995, %v990_v52 }
  0x37   :  { %1530 = vst [vmem:[#allocation19_spill] sm:$0xff] %v1014_v11  ;;  %v1034_v56 = vsel %vm254_vm0, %v262_v58, %v297_v40  ;;  %v70_v11 = vld [vmem:[#allocation2 + $0x30] sm:$0xff]  ;;  %v1134_v26 = vmul.f32 8.0, %v1546_v41  ;;  %vm679_vm5 = vcmask 0  }
  0x38   :  { %v472_v16 = vmul.f32 7.9999995, %v380_v15  ;;  %1532 = vst [vmem:[#allocation21_spill] sm:$0xff] %v1034_v56  ;;  %v319_v15 = vrot.slane %v988_v49, 7  ;;  %1559 = vst [vmem:[#allocation41_spill] sm:$0xff] %v1206_v12 }
  0x39   :  { %195 = vrot.lane.b32.xlu1 %v796_v2, %s756_s9  ;;  %193 = vrot.lane.b32.xlu0 %v788_v0, %s756_s9  ;;  %1547 = vst [vmem:[#allocation31_spill] sm:$0xff] %v1134_v26  ;;  %v68_v26 = vld [vmem:[#allocation2 + $0x20] sm:$0xff]  ;;  %v1223_v12 = vmul.f32 -7099.9995, %v1008_v9 }
  0x3a   :  { %v1023_v27 = vmul.f32 %v472_v16, %v788_v0  ;;  %v273_v16 = vrot.slane %v1008_v9, 1  ;;  %v1041_v38 = vsel %vm311_vm1, %v318_v59, %v319_v15 }
  0x3b   :  { %1533 = vst [vmem:[#allocation22_spill] sm:$0xff] %v1041_v38  ;;  %v381_v25 = vsub.f32 %v1034_v56, %v1041_v38  ;;  %v66_v38 = vld [vmem:[#allocation2 + $0x10] sm:$0xff]  ;;  %1564 = vst [vmem:[#allocation46_spill] sm:$0xff] %v1223_v12 }
  0x3c   :  { %1531 = vst [vmem:[#allocation20_spill] sm:$0xff] %v1023_v27  ;;  %v1046_v5 = vsel %vm254_vm0, %v273_v16, %v274_v48  ;;  %v71_v27 = vld [vmem:[#allocation2 + $0x38] sm:$0xff] }
  0x3d   :  { %207 = vrot.lane.b32.xlu1 %v820_v18, %s756_s9  ;;  %205 = vrot.lane.b32.xlu0 %v822_v19, %s756_s9  ;;  %1534 = vst [vmem:[#allocation23_spill] sm:$0xff] %v1046_v5  ;;  %v473_v59 = vmul.f32 7.9999995, %v381_v25  ;;  %v1076_v25 = vsel %vm311_vm1, %v330_v39, %v331_v46 }
  0x3e   :  { %1539 = vst [vmem:[#allocation28_spill] sm:$0xff] %v1076_v25 }
  0x3f   :  { %v1058_v63 = vmul.f32 %v473_v59, %v796_v2 }
  0x41   :  { %211 = vrot.lane.b32.xlu1 %v867_v36, %s756_s9  ;;  %209 = vrot.lane.b32.xlu0 %v869_v37, %s756_s9  ;;  %1536 = vst [vmem:[#allocation25_spill] sm:$0xff] %v1058_v63  ;;  %v1543_v63 = vrot.slane %v822_v19, 7 }
  0x45   :  { %118 = vrot.lane.b32.xlu1 %v988_v49, %s750_s8  ;;  %116 = vrot.lane.b32.xlu0 %v990_v52, %s750_s8 }
  0x49   :  { %122 = vrot.lane.b32.xlu1 %v802_v6, %s750_s8  ;;  %120 = vrot.lane.b32.xlu0 %v804_v7, %s750_s8 }
  0x4d   :  { %134 = vrot.lane.b32.xlu1 %v1006_v61, %s750_s8  ;;  %132 = vrot.lane.b32.xlu0 %v1008_v9, %s750_s8 }
  0x51   :  { %138 = vrot.lane.b32.xlu1 %v815_v14, %s750_s8  ;;  %136 = vrot.lane.b32.xlu0 %v832_v24, %s750_s8 }
  0x55   :  { %197 = vrot.lane.b32.xlu1 %v990_v52, %s756_s9  ;;  %166 = vrot.lane.b32.xlu0 %v752_v8, %s755_s1  ;;  %v1049_v8 = vsel %vm311_vm1, -2.0, %v330_v39 }
  0x56   :  { %1535 = vst [vmem:[#allocation24_spill] sm:$0xff] %v1049_v8  ;;  %v388_v58 = vsub.f32 %v1046_v5, %v1049_v8  ;;  %v1113_v5 = vsel %vm311_vm1, -0.2, %v1543_v63 }
  0x57   :  { %1544 = vst [vmem:[#allocation30_spill] sm:$0xff] %v1113_v5 }
  0x58   :  { %v474_v15 = vmul.f32 7.9999995, %v388_v58 }
  0x59   :  { %201 = vrot.lane.b32.xlu1 %v804_v7, %s756_s9  ;;  %199 = vrot.lane.b32.xlu0 %v988_v49, %s756_s9  ;;  %v1068_v7 = vsel %vm254_vm0, %v274_v48, %v297_v40 }
  0x5a   :  { %v1065_v16 = vmul.f32 %v474_v15, %v869_v37  ;;  %1538 = vst [vmem:[#allocation27_spill] sm:$0xff] %v1068_v7  ;;  %v267_v15 = vrot.slane %v822_v19, 1 }
  0x5c   :  { %1537 = vst [vmem:[#allocation26_spill] sm:$0xff] %v1065_v16  ;;  %v67_v16 = vld [vmem:[#allocation2 + $0x18] sm:$0xff] }
  0x5d   :  { %213 = vrot.lane.b32.xlu1 %v1008_v9, %s756_s9  ;;  %203 = vrot.lane.b32.xlu0 %v802_v6, %s756_s9  ;;  %v389_v6 = vsub.f32 %v1068_v7, %v1076_v25  ;;  %v64_v25 = vld [vmem:[#allocation2] sm:$0xff]  ;;  %v1542_v7 = vrot.slane %v820_v18, 1  ;;  %v505_v53 = vsub.f32 %v796_v2, %v67_v16  ;;  %v499_v16 = vsub.f32 %v820_v18, %v71_v27 }
  0x5e   :  { %v496_v63 = vsub.f32 %v790_v1, %v64_v25  ;;  %v1549_v25 = vsub.f32 %v842_v29, %v865_v35  ;;  %v507_v29 = vsub.f32 %v867_v36, %v73_v44  ;;  %v506_v35 = vsub.f32 %v869_v37, %v72_v43  ;;  %v69_v43 = vld [vmem:[#allocation2 + $0x28] sm:$0xff] }
  0x5f   :  { %v475_v58 = vmul.f32 7.9999995, %v389_v6  ;;  %v1108_v8 = vsel %vm254_vm0, %v267_v15, %v1542_v7  ;;  %v1545_v7 = vsub.f32 %v825_v20, %v828_v21  ;;  %v504_v21 = vsub.f32 %v788_v0, %v66_v38 }
  0x60   :  { %v384_v10 = vsub.f32 %v1108_v8, %v1113_v5  ;;  %v1159_v38 = vmul.f32 4.0, %v790_v1  ;;  %v1163_v27 = vmul.f32 1000.0, %v496_v63  ;;  %v1178_v44 = vmul.f32 1000.0, %v499_v16  ;;  %v74_v5 = vld [vmem:[#allocation2 + $0x50] sm:$0xff] }
  0x61   :  { %217 = vrot.lane.b32.xlu1 %v832_v24, %s756_s9  ;;  %215 = vrot.lane.b32.xlu0 %v1006_v61, %s756_s9  ;;  %v1083_v40 = vmul.f32 %v475_v58, %v867_v36  ;;  %v255_v24 = vrot.slane %v790_v1, 1  ;;  %v1125_v15 = vmul.f32 8.0, %v1545_v7  ;;  %v1146_v7 = vmul.f32 8.0, %v1549_v25 }
  0x62   :  { %1551 = vst [vmem:[#allocation33_spill] sm:$0xff] %v1159_v38  ;;  %1552 = vst [vmem:[#allocation34_spill] sm:$0xff] %v1163_v27  ;;  %v1168_v25 = vmul.f32 1000.0, %v505_v53  ;;  %v1193_v4 = vmul.f32 1000.0, %v507_v29  ;;  %v1196_v16 = vmul.f32 4.0, %v869_v37  ;;  %v75_v38 = vld [vmem:[#allocation2 + $0x58] sm:$0xff] }
  0x63   :  { %1540 = vst [vmem:[#allocation29_spill] sm:$0xff] %v1083_v40  ;;  %v1098_v6 = vsel %vm254_vm0, %v255_v24, %v256_v45  ;;  %v65_v40 = vld [vmem:[#allocation2 + $0x8] sm:$0xff]  ;;  %1550 = vst [vmem:[#allocation32_spill] sm:$0xff] %v1146_v7  ;;  %v1176_v7 = vmul.f32 4.0, %v820_v18  ;;  %v1212_v29 = vmul.f32 4.0, %v990_v52 }
  0x64   :  { %v497_v56 = vsub.f32 %v798_v3, %v65_v40  ;;  %v1548_v40 = vsub.f32 %v839_v28, %v845_v30  ;;  %v498_v30 = vsub.f32 %v822_v19, %v70_v11  ;;  %v1171_v11 = vmul.f32 4.0, %v788_v0  ;;  %1554 = vst [vmem:[#allocation36_spill] sm:$0xff] %v1178_v44 }
  0x65   :  { %219 = vrot.lane.b32.xlu0 %v815_v14, %s756_s9  ;;  %v1541_v14 = vrot.slane %v790_v1, 7  ;;  %1553 = vst [vmem:[#allocation35_spill] sm:$0xff] %v1176_v7  ;;  %v1198_v44 = vmul.f32 1000.0, %v506_v35  ;;  %v512_v7 = vsub.f32 %v990_v52, %v68_v26  ;;  %1561 = vst [vmem:[#allocation43_spill] sm:$0xff] %v1212_v29  ;;  %v514_v35 = vsub.f32 %v1008_v9, %v74_v5 }
  0x66   :  { %v1139_v20 = vmul.f32 8.0, %v1548_v40  ;;  %v1156_v41 = vmul.f32 1000.0, %v497_v56  ;;  %v1166_v40 = vmul.f32 4.0, %v796_v2  ;;  %v1173_v56 = vmul.f32 1000.0, %v504_v21 }
  0x67   :  { %v1103_v58 = vsel %vm311_vm1, -0.2, %v1541_v14  ;;  %v1185_v53 = vmul.f32 1000.0, %v498_v30  ;;  %v513_v30 = vsub.f32 %v988_v49, %v69_v43  ;;  %v1219_v26 = vmul.f32 0.0, %v796_v2 }
  0x68   :  { %v376_v14 = vsub.f32 %v1098_v6, %v1103_v58  ;;  %v1229_v29 = vmul.f32 -7099.9995, %v1006_v61  ;;  %v1231_v5 = vmul.f32 999.99994, %v512_v7  ;;  %v1237_v2 = vmul.f32 4.0, %v988_v49 }
  0x69   :  { %1556 = vst [vmem:[#allocation38_spill] sm:$0xff] %v1185_v53  ;;  %1563 = vst [vmem:[#allocation45_spill] sm:$0xff] %v1219_v26  ;;  %v1240_v26 = vmul.f32 0.0, %v867_v36  ;;  %v1251_v7 = vmul.f32 -71.0, %v798_v3 }
  0x6a   :  { %v456_v28 = vmul.f32 8.0, %v376_v14  ;;  %v458_v14 = vmul.f32 8.0, %v384_v10  ;;  %v1188_v10 = vmul.f32 4.0, %v867_v36  ;;  %1566 = vst [vmem:[#allocation48_spill] sm:$0xff] %v1231_v5  ;;  %1568 = vst [vmem:[#allocation50_spill] sm:$0xff] %v1237_v2  ;;  %v1257_v2 = vmul.f32 4.0, %v1006_v61 }
  0x6b   :  { %1569 = vst [vmem:[#allocation51_spill] sm:$0xff] %v1240_v26  ;;  %1573 = vst [vmem:[#allocation55_spill] sm:$0xff] %v1251_v7 }
  0x6c   :  { %v1191_v21 = vmul.f32 %v456_v28, %v788_v0  ;;  %v1203_v53 = vmul.f32 %v458_v14, %v869_v37  ;;  %v1209_v28 = vmul.f32 -7099.9995, %v988_v49  ;;  %1575 = vst [vmem:[#allocation57_spill] sm:$0xff] %v1257_v2  ;;  %v1273_v2 = vmul.f32 -0.99999994, %v988_v49 }
  0x6e   :  { %1557 = vst [vmem:[#allocation39_spill] sm:$0xff] %v1191_v21  ;;  %1558 = vst [vmem:[#allocation40_spill] sm:$0xff] %v1203_v53  ;;  %v1216_v21 = vmul.f32 0.0, %v788_v0  ;;  %v515_v53 = vsub.f32 %v1006_v61, %v75_v38  ;;  %v1234_v0 = vmul.f32 -71.0, %v790_v1 }
  0x6f   :  { %1560 = vst [vmem:[#allocation42_spill] sm:$0xff] %v1209_v28  ;;  %v1226_v28 = vmul.f32 0.0, %v869_v37  ;;  %v1246_v37 = vmul.f32 4.0, %v1008_v9  ;;  %1579 = vst [vmem:[#allocation61_spill] sm:$0xff] %v1273_v2 }
  0x70   :  { %1562 = vst [vmem:[#allocation44_spill] sm:$0xff] %v1216_v21  ;;  %1567 = vst [vmem:[#allocation49_spill] sm:$0xff] %v1234_v0  ;;  %v1243_v21 = vmul.f32 999.99994, %v513_v30  ;;  %v1254_v0 = vmul.f32 -71.0, %v822_v19 }
  0x71   :  { %1565 = vst [vmem:[#allocation47_spill] sm:$0xff] %v1226_v28  ;;  %1571 = vst [vmem:[#allocation53_spill] sm:$0xff] %v1246_v37  ;;  %v1248_v28 = vmul.f32 999.99994, %v514_v35  ;;  %v1265_v35 = vmul.f32 -71.0, %v820_v18 }
  0x72   :  { %1570 = vst [vmem:[#allocation52_spill] sm:$0xff] %v1243_v21  ;;  %1574 = vst [vmem:[#allocation56_spill] sm:$0xff] %v1254_v0  ;;  %v1262_v21 = vmul.f32 999.99994, %v515_v53 }
  0x73   :  { %1572 = vst [vmem:[#allocation54_spill] sm:$0xff] %v1248_v28  ;;  %1577 = vst [vmem:[#allocation59_spill] sm:$0xff] %v1265_v35  ;;  %v1268_v28 = vmul.f32 -0.99999994, %v990_v52  ;;  %v1281_v35 = vmul.f32 -0.99999994, %v1008_v9 }
  0x74   :  { %1576 = vst [vmem:[#allocation58_spill] sm:$0xff] %v1262_v21  ;;  %v1284_v52 = vmul.f32 -0.99999994, %v1006_v61 }
  0x75   :  { %1578 = vst [vmem:[#allocation60_spill] sm:$0xff] %v1268_v28 }
  0x76   :  { %1580 = vst [vmem:[#allocation62_spill] sm:$0xff] %v1284_v52 }
  0x93   :  { %v1085_v48 = vpop.permute.xlu1 %112  ;;  %v1087_v59 = vpop.permute.xlu0 %108 }
  0x97   :  { %v1091_v39 = vpop.permute.xlu1 %114  ;;  %v1093_v46 = vpop.permute.xlu0 %110 }
  0x9b   :  { %v1115_v45 = vpop.permute.xlu1 %126  ;;  %v1117_v24 = vpop.permute.xlu0 %124 }
  0x9f   :  { %v1148_v23 = vpop.permute.xlu1 %130  ;;  %v1150_v33 = vpop.permute.xlu0 %128 }
  0xa3   :  { %v710_v63 = vpop.permute.xlu1 %709  ;;  %v1180_v27 = vpop.permute.xlu0 %160 }
  0xa4   :  { %v711_v38 = vunpack.i.l.bf16 %v710_v63  ;;  %v174_v36 = vsel %vm172_vm3, %v1093_v46, %v1180_v27  ;;  %v173_v46 = vsel %vm172_vm3, %v1087_v59, %v1180_v27  ;;  %v1287_v49 = vunpack.i.h.bf16 %v710_v63 }
  0xa5   :  { %v182_v59 = vsel %vm172_vm3, %v1115_v45, %v1180_v27  ;;  %v181_v63 = vsel %vm172_vm3, %v1117_v24, %v1180_v27 }
  0xa6   :  { %v176_v53 = vsel %vm172_vm3, %v1091_v39, %v711_v38 }
  0xa7   :  { %v192_v43 = vpop.permute.xlu1 %191  ;;  %v190_v14 = vpop.permute.xlu0 %189 }
  0xa8   :  { %v239_v12 = vsel %vm237_vm2, -0.2, %v192_v43  ;;  %v238_v0 = vsel %vm237_vm2, -0.2, %v190_v14 }
  0xa9   :  { %v393_v7 = vadd.f32 %v239_v12, %v174_v36  ;;  %v361_v21 = vsub.f32 %v174_v36, %v239_v12  ;;  %v360_v2 = vsub.f32 %v173_v46, %v238_v0  ;;  %v392_v5 = vadd.f32 %v238_v0, %v173_v46 }
  0xaa   :  { %v175_v12 = vsel %vm172_vm3, %v1085_v48, %v711_v38  ;;  %v184_v0 = vsel %vm172_vm3, %v1148_v23, %v711_v38 }
  0xab   :  { %v196_v30 = vpop.permute.xlu1 %195  ;;  %v194_v43 = vpop.permute.xlu0 %193  ;;  %v405_v9 = vadd.f32 %v393_v7, %v906_v54  ;;  %v452_v7 = vmul.f32 8.0, %v360_v2 }
  0xac   :  { %v241_v37 = vsel %vm237_vm2, 0.125, %v196_v30  ;;  %v240_v30 = vsel %vm237_vm2, 0.125, %v194_v43  ;;  %v453_v43 = vmul.f32 8.0, %v361_v21 }
  0xad   :  { %v363_v14 = vsub.f32 %v176_v53, %v241_v37  ;;  %v395_v28 = vadd.f32 %v241_v37, %v176_v53  ;;  %v362_v37 = vsub.f32 %v175_v12, %v240_v30  ;;  %v394_v36 = vadd.f32 %v240_v30, %v175_v12 }
  0xae   :  { %v1307_v24 = vadd.f32 %v405_v9, %v911_v55  ;;  %v525_v2 = vmul.f32 %v453_v43, %v798_v3 }
  0xaf   :  { %v208_v26 = vpop.permute.xlu1 %207  ;;  %v206_v39 = vpop.permute.xlu0 %205  ;;  %v407_v61 = vadd.f32 %v395_v28, %v849_v31  ;;  %v461_v52 = vmul.f32 8.0, %v363_v14  ;;  %v404_v28 = vadd.f32 %v392_v5, %v1098_v6  ;;  %v406_v48 = vadd.f32 %v394_v36, %v897_v51 }
  0xb0   :  { %v247_v31 = vsel %vm237_vm2, -0.2, %v208_v26  ;;  %v460_v46 = vmul.f32 8.0, %v362_v37  ;;  %v246_v51 = vsel %vm237_vm2, -0.2, %v206_v39  ;;  %v521_v5 = vadd.f32 %v879_v42, %v453_v43 }
  0xb1   :  { %v419_v45 = vadd.f32 %v407_v61, %v852_v32  ;;  %v557_v54 = vmul.f32 %v461_v52, %v798_v3  ;;  %v183_v32 = vsel %vm172_vm3, %v1150_v33, %v711_v38  ;;  %v418_v21 = vadd.f32 %v406_v48, %v894_v50 }
  0xb2   :  { %v556_v6 = vmul.f32 %v460_v46, %v790_v1  ;;  %v399_v26 = vadd.f32 %v247_v31, %v182_v59  ;;  %v369_v52 = vsub.f32 %v182_v59, %v247_v31  ;;  %v368_v9 = vsub.f32 %v181_v63, %v246_v51 }
  0xb3   :  { %v212_v53 = vpop.permute.xlu1 %211  ;;  %v210_v14 = vpop.permute.xlu0 %209  ;;  %v443_v23 = vsub.f32 %v419_v45, %v1166_v40  ;;  %v561_v27 = vadd.f32 %v557_v54, %v1168_v25  ;;  %v1320_v40 = vadd.f32 %v404_v28, %v1103_v58  ;;  %v520_v25 = vadd.f32 %v914_v57, %v452_v7 }
  0xb4   :  { %v442_v33 = vsub.f32 %v418_v21, %v1171_v11  ;;  %v560_v50 = vadd.f32 %v556_v6, %v1173_v56  ;;  %v398_v61 = vadd.f32 %v246_v51, %v181_v63  ;;  %v524_v58 = vmul.f32 %v452_v7, %v790_v1  ;;  %v1582_v6 = vld [vmem:[#allocation10_spill] sm:$0xff] }
  0xb5   :  { %v569_v55 = vadd.f32 %v889_v47, %v561_v27  ;;  %v489_v39 = vmul.f32 -181.76, %v443_v23  ;;  %v441_v47 = vsub.f32 %v1307_v24, %v1153_v34  ;;  %v411_v11 = vadd.f32 %v399_v26, %v956_v17  ;;  %v1581_v27 = vld [vmem:[#allocation33_spill] sm:$0xff] }
  0xb6   :  { %v568_v57 = vadd.f32 %v930_v62, %v560_v50  ;;  %v488_v56 = vmul.f32 -181.76, %v442_v33  ;;  %v455_v12 = vmul.f32 8.0, %v369_v52  ;;  %v249_v37 = vsel %vm237_vm2, 0.125, %v212_v53  ;;  %v1585_v52 = vld [vmem:[#allocation34_spill] sm:$0xff] }
  0xb7   :  { %v1325_v38 = vpop.permute.xlu1 %118  ;;  %v1327_v30 = vpop.permute.xlu0 %116  ;;  %v573_v42 = vadd.f32 %v569_v55, %v1139_v20  ;;  %v371_v43 = vsub.f32 %v184_v0, %v249_v37  ;;  %v401_v20 = vadd.f32 %v249_v37, %v184_v0  ;;  %v248_v63 = vsel %vm237_vm2, 0.125, %v210_v14  ;;  %v1584_v55 = vld [vmem:[#allocation11_spill] sm:$0xff]  ;;  %v1588_v37 = vld [vmem:[#allocation13_spill] sm:$0xff] }
  0xb8   :  { %v572_v36 = vadd.f32 %v568_v57, %v1125_v15  ;;  %v410_v31 = vadd.f32 %v398_v61, %v1108_v8  ;;  %v454_v62 = vmul.f32 8.0, %v368_v9  ;;  %v370_v28 = vsub.f32 %v183_v32, %v248_v63  ;;  %v1587_v61 = vld [vmem:[#allocation12_spill] sm:$0xff] }
  0xb9   :  { %v577_v59 = vadd.f32 %v573_v42, %v489_v39  ;;  %v400_v17 = vadd.f32 %v248_v63, %v183_v32  ;;  %v529_v7 = vadd.f32 %v525_v2, %v1156_v41  ;;  %v413_v46 = vadd.f32 %v401_v20, %v920_v60  ;;  %v1583_v60 = vld [vmem:[#allocation30_spill] sm:$0xff]  ;;  %v1586_v42 = vld [vmem:[#allocation35_spill] sm:$0xff] }
  0xba   :  { %v576_v48 = vadd.f32 %v572_v36, %v488_v56  ;;  %v463_v53 = vmul.f32 8.0, %v371_v43  ;;  %v1345_v15 = vmul.f32 %v521_v5, %v521_v5  ;;  %v423_v0 = vadd.f32 %v411_v11, %v961_v22  ;;  %v1589_v43 = vld [vmem:[#allocation14_spill] sm:$0xff] }
  0xbb   :  { %v1338_v45 = vpop.permute.xlu1 %122  ;;  %v1340_v54 = vpop.permute.xlu0 %120  ;;  %v412_v14 = vadd.f32 %v400_v17, %v945_v13  ;;  %v462_v23 = vmul.f32 8.0, %v370_v28  ;;  %v440_v21 = vsub.f32 %v1320_v40, %v1581_v27  ;;  %v527_v8 = vmul.f32 %v455_v12, %v820_v18  ;;  %v1592_v28 = vld [vmem:[#allocation36_spill] sm:$0xff] }
  0xbc   :  { %v425_v32 = vadd.f32 %v413_v46, %v1582_v6  ;;  %v559_v41 = vmul.f32 %v463_v53, %v820_v18  ;;  %v422_v2 = vadd.f32 %v410_v31, %v1583_v60  ;;  %v526_v5 = vmul.f32 %v454_v62, %v822_v19  ;;  %v1594_v53 = vld [vmem:[#allocation38_spill] sm:$0xff]  ;;  %v1597_v27 = vld [vmem:[#allocation44_spill] sm:$0xff] }
  0xbd   :  { %v424_v22 = vadd.f32 %v412_v14, %v1584_v55  ;;  %v558_v13 = vmul.f32 %v462_v23, %v822_v19  ;;  %v528_v33 = vadd.f32 %v524_v58, %v1585_v52  ;;  %v1359_v50 = vmul.f32 %v520_v25, %v520_v25  ;;  %v1599_v55 = vld [vmem:[#allocation31_spill] sm:$0xff] }
  0xbe   :  { %v449_v40 = vsub.f32 %v425_v32, %v1188_v10  ;;  %v563_v39 = vadd.f32 %v559_v41, %v1193_v4  ;;  %v447_v9 = vsub.f32 %v423_v0, %v1586_v42  ;;  %v1365_v57 = vadd.f32 %v1587_v61, %v455_v12  ;;  %v1590_v10 = vld [vmem:[#allocation41_spill] sm:$0xff]  ;;  %v1591_v4 = vld [vmem:[#allocation42_spill] sm:$0xff]  ;;  %v1595_v0 = vld [vmem:[#allocation15_spill] sm:$0xff] }
  0xbf   :  { %v135_v26 = vpop.permute.xlu1 %134  ;;  %v133_v51 = vpop.permute.xlu0 %132  ;;  %v448_v11 = vsub.f32 %v424_v22, %v1196_v16  ;;  %v562_v56 = vadd.f32 %v558_v13, %v1198_v44  ;;  %v1370_v36 = vadd.f32 %v1588_v37, %v454_v62  ;;  %v584_v63 = vadd.f32 %v1590_v10, %v576_v48  ;;  %v1593_v12 = vld [vmem:[#allocation37_spill] sm:$0xff]  ;;  %v1596_v62 = vld [vmem:[#allocation32_spill] sm:$0xff]  ;;  %v1600_v52 = vld [vmem:[#allocation39_spill] sm:$0xff] }
  0xc0   :  { %v571_v58 = vadd.f32 %v1589_v43, %v563_v39  ;;  %v585_v31 = vadd.f32 %v1591_v4, %v577_v59  ;;  %v531_v17 = vadd.f32 %v527_v8, %v1592_v28  ;;  %v446_v46 = vsub.f32 %v422_v2, %v1593_v12  ;;  %v1598_v32 = vld [vmem:[#allocation45_spill] sm:$0xff]  ;;  %v1602_v43 = vld [vmem:[#allocation40_spill] sm:$0xff]  ;;  %v1604_v10 = vld [vmem:[#allocation18_spill] sm:$0xff] }
  0xc1   :  { %v530_v16 = vadd.f32 %v526_v5, %v1594_v53  ;;  %v570_v44 = vadd.f32 %v1595_v0, %v562_v56  ;;  %v491_v14 = vmul.f32 -181.76, %v449_v40  ;;  %v592_v6 = vadd.f32 %v1597_v27, %v584_v63  ;;  %v1608_v0 = vld [vmem:[#allocation19_spill] sm:$0xff] }
  0xc2   :  { %v575_v23 = vadd.f32 %v571_v58, %v1596_v62  ;;  %v593_v41 = vadd.f32 %v1598_v32, %v585_v31  ;;  %v490_v60 = vmul.f32 -181.76, %v448_v11  ;;  %v178_v59 = vsel %vm172_vm3, %v1325_v38, %v1287_v49  ;;  %v1601_v11 = vld [vmem:[#allocation16_spill] sm:$0xff]  ;;  %v1605_v31 = vld [vmem:[#allocation17_spill] sm:$0xff] }
  0xc3   :  { %v1373_v25 = vpop.permute.xlu1 %138  ;;  %v137_v20 = vpop.permute.xlu0 %136  ;;  %v574_v48 = vadd.f32 %v570_v44, %v1599_v55  ;;  %v177_v8 = vsel %vm172_vm3, %v1327_v30, %v1287_v49  ;;  %v484_v13 = vmul.f32 -181.76, %v440_v21  ;;  %v536_v40 = vadd.f32 %v1600_v52, %v528_v33 }
  0xc4   :  { %v579_v2 = vadd.f32 %v575_v23, %v491_v14  ;;  %v1395_v39 = vmul.f32 -181.76, %v441_v47  ;;  %v1399_v61 = vsel %vm172_vm3, %v135_v26, %v1287_v49  ;;  %v537_v30 = vadd.f32 %v1601_v11, %v529_v7  ;;  %v1603_v47 = vld [vmem:[#allocation46_spill] sm:$0xff] }
  0xc5   :  { %v578_v42 = vadd.f32 %v574_v48, %v490_v60  ;;  %v185_v56 = vsel %vm172_vm3, %v133_v51, %v1287_v49  ;;  %v1405_v33 = vmul.f32 -181.76, %v446_v46  ;;  %v1408_v34 = vadd.f32 %v1602_v43, %v530_v16  ;;  %v1606_v46 = vld [vmem:[#allocation47_spill] sm:$0xff]  ;;  %v1610_v48 = vld [vmem:[#allocation48_spill] sm:$0xff] }
  0xc6   :  { %v1410_v24 = vmul.f32 -181.76, %v447_v9  ;;  %v587_v26 = vadd.f32 %v1229_v29, %v579_v2  ;;  %v1418_v28 = vadd.f32 %v1605_v31, %v531_v17  ;;  %v1607_v16 = vld [vmem:[#allocation51_spill] sm:$0xff]  ;;  %v1432_v27 = vmul.f32 %v592_v6, %v592_v6 }
  0xc7   :  { %v198_v5 = vpop.permute.xlu1 %197  ;;  %v167_v22 = vpop.permute.xlu0 %166  ;;  %v586_v58 = vadd.f32 %v1603_v47, %v578_v42  ;;  %v1434_v32 = vmul.f32 %v593_v41, %v593_v41  ;;  %v1609_v60 = vld [vmem:[#allocation43_spill] sm:$0xff]  ;;  %v1613_v47 = vld [vmem:[#allocation22_spill] sm:$0xff] }
  0xc8   :  { %v242_v38 = vsel %vm237_vm2, -2.0, %v198_v5  ;;  %v179_v49 = vsel %vm172_vm3, %v1340_v54, %v167_v22  ;;  %v1426_v29 = vadd.f32 %v1607_v16, %v587_v26  ;;  %v180_v17 = vsel %vm172_vm3, %v1338_v45, %v167_v22  ;;  %v1616_v16 = vld [vmem:[#allocation23_spill] sm:$0xff] }
  0xc9   :  { %v364_v21 = vsub.f32 %v177_v8, %v242_v38  ;;  %v396_v37 = vadd.f32 %v242_v38, %v177_v8  ;;  %v1423_v53 = vadd.f32 %v1606_v46, %v586_v58  ;;  %v1611_v38 = vld [vmem:[#allocation21_spill] sm:$0xff]  ;;  %v187_v45 = vsel %vm172_vm3, %v137_v20, %v167_v22 }
  0xcb   :  { %v408_v63 = vadd.f32 %v396_v37, %v1604_v10  ;;  %v468_v4 = vmul.f32 7.9999995, %v364_v21  ;;  %v202_v7 = vpop.permute.xlu1 %201  ;;  %v200_v51 = vpop.permute.xlu0 %199  ;;  %v1612_v21 = vld [vmem:[#allocation20_spill] sm:$0xff] }
  0xcc   :  { %v244_v12 = vsel %vm237_vm2, -0.0, %v202_v7  ;;  %v243_v9 = vsel %vm237_vm2, -2.0, %v200_v51  ;;  %v1614_v7 = vld [vmem:[#allocation52_spill] sm:$0xff] }
  0xcd   :  { %v420_v44 = vadd.f32 %v408_v63, %v1608_v0  ;;  %v596_v14 = vmul.f32 %v468_v4, %v790_v1  ;;  %v366_v62 = vsub.f32 %v179_v49, %v244_v12  ;;  %v365_v54 = vsub.f32 %v178_v59, %v243_v9 }
  0xce   :  { %v397_v23 = vadd.f32 %v243_v9, %v178_v59  ;;  %v188_v12 = vsel %vm172_vm3, %v1373_v25, %v167_v22  ;;  %v1615_v9 = vld [vmem:[#allocation50_spill] sm:$0xff] }
  0xcf   :  { %v444_v55 = vsub.f32 %v420_v44, %v1609_v60  ;;  %v600_v8 = vadd.f32 %v596_v14, %v1610_v48  ;;  %v476_v2 = vmul.f32 8.0, %v366_v62  ;;  %v469_v5 = vmul.f32 7.9999995, %v365_v54  ;;  %v214_v52 = vpop.permute.xlu1 %213  ;;  %v204_v42 = vpop.permute.xlu0 %203  ;;  %v1617_v44 = vld [vmem:[#allocation49_spill] sm:$0xff] }
  0xd0   :  { %v409_v1 = vadd.f32 %v397_v23, %v1611_v38  ;;  %v250_v11 = vsel %vm237_vm2, -2.0, %v214_v52  ;;  %v245_v59 = vsel %vm237_vm2, -0.0, %v204_v42  ;;  %v1618_v62 = vld [vmem:[#allocation25_spill] sm:$0xff] }
  0xd1   :  { %v492_v6 = vmul.f32 -426.66666, %v444_v55  ;;  %v608_v41 = vadd.f32 %v1612_v21, %v600_v8  ;;  %v540_v37 = vadd.f32 %v536_v40, %v476_v2  ;;  %v597_v43 = vmul.f32 %v469_v5, %v798_v3  ;;  %v1620_v5 = vld [vmem:[#allocation60_spill] sm:$0xff]  ;;  %v1621_v42 = vld [vmem:[#allocation53_spill] sm:$0xff] }
  0xd2   :  { %v421_v58 = vadd.f32 %v409_v1, %v1613_v47  ;;  %v372_v26 = vsub.f32 %v185_v56, %v250_v11  ;;  %v402_v10 = vadd.f32 %v250_v11, %v185_v56  ;;  %v367_v63 = vsub.f32 %v180_v17, %v245_v59  ;;  %v1619_v17 = vld [vmem:[#allocation24_spill] sm:$0xff]  ;;  %v1622_v1 = vld [vmem:[#allocation54_spill] sm:$0xff]  ;;  %v1625_v47 = vld [vmem:[#allocation55_spill] sm:$0xff] }
  0xd3   :  { %v544_v4 = vadd.f32 %v540_v37, %v484_v13  ;;  %v601_v49 = vadd.f32 %v597_v43, %v1614_v7  ;;  %v218_v51 = vpop.permute.xlu1 %217  ;;  %v216_v31 = vpop.permute.xlu0 %215  ;;  %v612_v20 = vadd.f32 %v608_v41, %v492_v6  ;;  %v1624_v43 = vld [vmem:[#allocation26_spill] sm:$0xff] }
  0xd4   :  { %v445_v46 = vsub.f32 %v421_v58, %v1615_v9  ;;  %v414_v40 = vadd.f32 %v402_v10, %v1616_v16  ;;  %v470_v0 = vmul.f32 7.9999995, %v372_v26  ;;  %v477_v3 = vmul.f32 8.0, %v367_v63  ;;  %v1626_v63 = vld [vmem:[#allocation28_spill] sm:$0xff]  ;;  %v1627_v9 = vld [vmem:[#allocation57_spill] sm:$0xff]  ;;  %v1628_v16 = vld [vmem:[#allocation58_spill] sm:$0xff] }
  0xd5   :  { %v552_v14 = vadd.f32 %v1617_v44, %v544_v4  ;;  %v609_v56 = vadd.f32 %v1618_v62, %v601_v49  ;;  %v252_v13 = vsel %vm237_vm2, -0.0, %v218_v51  ;;  %v251_v54 = vsel %vm237_vm2, -2.0, %v216_v31  ;;  %v1630_v62 = vld [vmem:[#allocation56_spill] sm:$0xff] }
  0xd6   :  { %v493_v23 = vmul.f32 -426.66666, %v445_v46  ;;  %v426_v60 = vadd.f32 %v414_v40, %v1619_v17  ;;  %v598_v25 = vmul.f32 %v470_v0, %v822_v19  ;;  %v541_v22 = vadd.f32 %v537_v30, %v477_v3  ;;  %v1623_v19 = vld [vmem:[#allocation27_spill] sm:$0xff]  ;;  %v1629_v3 = vld [vmem:[#allocation61_spill] sm:$0xff] }
  0xd7   :  { %v374_v55 = vsub.f32 %v187_v45, %v252_v13  ;;  %v373_v48 = vsub.f32 %v1399_v61, %v251_v54  ;;  %v403_v8 = vadd.f32 %v251_v54, %v1399_v61  ;;  %v220_v2 = vpop.permute.xlu0 %219  ;;  %v620_v52 = vadd.f32 %v1620_v5, %v612_v20  ;;  %v1633_v5 = vld [vmem:[#allocation62_spill] sm:$0xff] }
  0xd8   :  { %v450_v38 = vsub.f32 %v426_v60, %v1621_v42  ;;  %v602_v11 = vadd.f32 %v598_v25, %v1622_v1  ;;  %v545_v59 = vadd.f32 %v541_v22, %v1395_v39  ;;  %v253_v6 = vsel %vm237_vm2, -0.0, %v220_v2  ;;  %v1632_v25 = vld [vmem:[#allocation59_spill] sm:$0xff] }
  0xd9   :  { %v478_v21 = vmul.f32 8.0, %v374_v55  ;;  %v415_v30 = vadd.f32 %v403_v8, %v1623_v19  ;;  %v471_v45 = vmul.f32 7.9999995, %v373_v48  ;;  %v375_v41 = vsub.f32 %v188_v12, %v253_v6 }
  0xda   :  { %v494_v37 = vmul.f32 -426.66666, %v450_v38  ;;  %v610_v61 = vadd.f32 %v1624_v43, %v602_v11  ;;  %v553_v58 = vadd.f32 %v1625_v47, %v545_v59  ;;  %v628_v26 = vmul.f32 %v552_v14, %v552_v14 }
  0xdb   :  { %v542_v10 = vadd.f32 %v1408_v34, %v478_v21  ;;  %v427_v4 = vadd.f32 %v415_v30, %v1626_v63  ;;  %v599_v7 = vmul.f32 %v471_v45, %v820_v18  ;;  %v479_v39 = vmul.f32 8.0, %v375_v41 }
  0xdc   :  { %v632_v49 = vadd.f32 %v628_v26, %v1359_v50  ;;  %v644_v51 = vmul.f32 %v620_v52, %v620_v52  ;;  %v613_v31 = vadd.f32 %v609_v56, %v493_v23  ;;  %v629_v20 = vmul.f32 %v553_v58, %v553_v58  ;;  %v1631_v56 = vld [vmem:[#allocation29_spill] sm:$0xff] }
  0xdd   :  { %v546_v12 = vadd.f32 %v542_v10, %v1405_v33  ;;  %v451_v46 = vsub.f32 %v427_v4, %v1627_v9  ;;  %v603_v40 = vadd.f32 %v599_v7, %v1628_v16  ;;  %v543_v0 = vadd.f32 %v1418_v28, %v479_v39 }
  0xde   :  { %v640_v34 = vadd.f32 %v1432_v27, %v632_v49  ;;  %v621_v44 = vadd.f32 %v1629_v3, %v613_v31  ;;  %v633_v18 = vadd.f32 %v629_v20, %v1345_v15  ;;  %v614_v14 = vadd.f32 %v610_v61, %v494_v37 }
  0xdf   :  { %v554_v50 = vadd.f32 %v1630_v62, %v546_v12  ;;  %v495_v13 = vmul.f32 -426.66666, %v451_v46  ;;  %v611_v54 = vadd.f32 %v1631_v56, %v603_v40  ;;  %v547_v33 = vadd.f32 %v543_v0, %v1410_v24 }
  0xe0   :  { %v648_v23 = vadd.f32 %v644_v51, %v640_v34  ;;  %v641_v17 = vadd.f32 %v1434_v32, %v633_v18  ;;  %v645_v60 = vmul.f32 %v621_v44, %v621_v44  ;;  %v622_v28 = vadd.f32 %v1281_v35, %v614_v14 }
  0xe1   :  { %v626_v27 = vmul.f32 %v1370_v36, %v1370_v36  ;;  %v555_v22 = vadd.f32 %v1632_v25, %v547_v33  ;;  %v630_v15 = vmul.f32 %v554_v50, %v554_v50  ;;  %v615_v55 = vadd.f32 %v611_v54, %v495_v13 }
  0xe2   :  { %v627_v48 = vmul.f32 %v1365_v57, %v1365_v57  ;;  %v653_v8 = vsel %vm652_vm4, %v648_v23, 0.0  ;;  %v649_v2 = vadd.f32 %v645_v60, %v641_v17  ;;  %v638_v32 = vmul.f32 %v1423_v53, %v1423_v53 }
  0xe3   :  { %654 = vadd.xlane.f32.xlu1 %v653_v8  ;;  %v634_v24 = vadd.f32 %v630_v15, %v626_v27  ;;  %v623_v35 = vadd.f32 %v1633_v5, %v615_v55  ;;  %v631_v52 = vmul.f32 %v555_v22, %v555_v22  ;;  %v646_v38 = vmul.f32 %v622_v28, %v622_v28 }
  0xe4   :  { %v656_v36 = vsel %vm652_vm4, %v649_v2, 0.0  ;;  %v639_v57 = vmul.f32 %v1426_v29, %v1426_v29 }
  0xe5   :  { %657 = vadd.xlane.f32.xlu0 %v656_v36  ;;  %v642_v42 = vadd.f32 %v638_v32, %v634_v24  ;;  %v635_v1 = vadd.f32 %v631_v52, %v627_v48  ;;  %v647_v6 = vmul.f32 %v623_v35, %v623_v35 }
  0xe7   :  { %v650_v11 = vadd.f32 %v646_v38, %v642_v42  ;;  %v643_v59 = vadd.f32 %v639_v57, %v635_v1 }
  0xe9   :  { %v659_v21 = vsel %vm652_vm4, %v650_v11, 0.0  ;;  %v651_v19 = vadd.f32 %v647_v6, %v643_v59 }
  0xea   :  { %660 = vadd.xlane.f32.xlu0 %v659_v21 }
  0xeb   :  { %v662_v53 = vsel %vm652_vm4, %v651_v19, 0.0 }
  0xec   :  { %663 = vadd.xlane.f32.xlu1 %v662_v53 }
 0x170   :  { %v655_v30 = vpop.xlane.xlu1 %654 }
 0x172   :  { %v658_v45 = vpop.xlane.xlu0 %657 }
 0x173   :  { %v665_v41 = vadd.f32 %v658_v45, %v655_v30 }
 0x175   :  { %v666_v37 = vrot.slane %v665_v41, 4 }
 0x177   :  { %v667_v43 = vadd.f32 %v666_v37, %v665_v41  ;;  %v661_v47 = vpop.xlane.xlu0 %660 }
 0x179   :  { %v668_v61 = vrot.slane %v667_v43, 2  ;;  %v664_v58 = vpop.xlane.xlu1 %663 }
 0x17a   :  { %v672_v26 = vadd.f32 %v664_v58, %v661_v47 }
 0x17b   :  { %v669_v29 = vadd.f32 %v668_v61, %v667_v43 }
 0x17c   :  { %v673_v10 = vrot.slane %v672_v26, 4 }
 0x17d   :  { %v670_v63 = vrot.slane %v669_v29, 1 }
 0x17e   :  { %v674_v4 = vadd.f32 %v673_v10, %v672_v26 }
 0x17f   :  { %v671_v7 = vadd.f32 %v670_v63, %v669_v29 }
 0x180   :  { %v675_v39 = vrot.slane %v674_v4, 2 }
 0x181   :  { %680 = vst.msk [vmem:[%s1504_s2] sm:$0x1] %vm679_vm5, %v671_v7 }
 0x182   :  { %v676_v49 = vadd.f32 %v675_v39, %v674_v4 }
 0x184   :  { %v677_v51 = vrot.slane %v676_v49, 1 }
 0x186   :  { %v678_v31 = vadd.f32 %v677_v51, %v676_v49 }
 0x188   :  { %681 = vst.msk [vmem:[%s1504_s2 + $0x1] sm:$0x1] %vm679_vm5, %v678_v31 }
 0x189   :  { %686 = vsyncpa [#allocation3], 1 }
 0x18a   :  { %687 = vsyncpa [#allocation5], 1 }

</bundles_post_ra>
